<compile_context>
chip_gen: v5e
topology: v5e:2x2
jax: 0.10.0
libtpu: 0.0.40
codegen_flags: <defaults>
</compile_context>

<pallas_src>
import functools

import jax
import jax.numpy as jnp
from jax import lax
from jax.experimental import pallas as pl
from jax.experimental.pallas import tpu as pltpu


def _round_up(x, m):
    return ((x + m - 1) // m) * m


def _taylor_ce_kernel(pred_ref, labels_ref, out_ref, *, t, n_total, tile_n, chunk_n):
    """One grid step: a (tile_n, C) tile of logits -> one partial-sum block.

    The partial sum of this tile's per-row Taylor losses is broadcast into the
    (1, 8, 128) output block; the wrapper reads [:, 0, 0] and divides by N.
    """
    step = pl.program_id(0)
    row0 = step * tile_n                 # first global row of this tile
    n_chunks = tile_n // chunk_n         # static Python int

    def chunk_loss_rows(c):
        """Per-row (masked) Taylor losses for sub-chunk c: shape (chunk_n, 1)."""
        start = pl.multiple_of(c * chunk_n, chunk_n)
        logits = pred_ref[pl.ds(start, chunk_n), :].astype(jnp.float32)  # (chunk, C)
        lbl = labels_ref[pl.ds(start, chunk_n), :]                       # (chunk, 1)

        # Slim softmax: never materialize the full `prob` tile.
        m = jnp.max(logits, axis=1, keepdims=True)                       # (chunk, 1)
        e = jnp.exp(logits - m)                                          # (chunk, C)
        denom = jnp.sum(e, axis=1, keepdims=True)                        # (chunk, 1)
        cls_ids = lax.broadcasted_iota(jnp.int32, logits.shape, 1)
        one_hot = (cls_ids == lbl).astype(jnp.float32)
        e_y = jnp.sum(e * one_hot, axis=1, keepdims=True)                # (chunk, 1)
        # Exact divide on a narrow (chunk, 1) vector (cheap); clipping p_y is
        # equivalent to the reference's full-prob clamp for this loss.
        p_y = jnp.clip(e_y / denom, 1e-7, 1.0 - 1e-7)

        # Taylor series: sum_{i=1..t} (1 - p_y)^i / i   (t is static)
        one_minus = 1.0 - p_y
        total = jnp.zeros_like(p_y)
        term = jnp.ones_like(p_y)
        for i in range(1, t + 1):
            term = term * one_minus
            total = total + term * (1.0 / i)

        # Mask rows past the end of the batch (ragged last tile).  Select (not
        # multiply) also neutralizes NaN/garbage in the padded region.
        row_ids = lax.broadcasted_iota(jnp.int32, p_y.shape, 0)
        valid = (row0 + start + row_ids) < n_total
        return jnp.where(valid, total, 0.0)                              # (chunk, 1)

    if n_chunks == 1:
        acc_rows = chunk_loss_rows(0)
    else:
        acc_rows = lax.fori_loop(
            0, n_chunks,
            lambda c, a: a + chunk_loss_rows(c),
            jnp.zeros((chunk_n, 1), jnp.float32),
            unroll=True)

    # Single cross-sublane reduction per grid step, then a lane-dense,
    # tiling-aligned (1, 8, 128) partial-sum block for this tile.
    partial = jnp.sum(acc_rows, keepdims=True)                           # (1, 1)
    out_ref[...] = jnp.broadcast_to(partial, out_ref.shape)


def taylor_ce(pred, labels, *, num_classes, t, tile_n=512, chunk_n=128):
    """pred: [N, C] float (f32 or bf16), labels: [N] int -> scalar mean loss.

    tile_n: rows per grid step (the HBM->VMEM DMA tile).  Size it against the
      VMEM budget (~2 buffers * tile_n * C * 4 bytes must fit the scoped limit,
      32 MiB default).  v7x has only 64 MiB physical VMEM, so halve tile_n
      there for very large C.
    chunk_n: rows processed per inner loop iteration (bounds vreg pressure).
    """
    n, c = pred.shape
    assert c == num_classes

    # Align tile sizes: chunk_n multiple of 8, tile_n multiple of chunk_n.
    chunk_n = max(8, min(chunk_n, _round_up(n, 8)))
    chunk_n = _round_up(chunk_n, 8)
    tile_n = max(chunk_n, min(tile_n, _round_up(n, chunk_n)))
    tile_n = _round_up(tile_n, chunk_n)
    num_tiles = pl.cdiv(n, tile_n)

    labels2d = labels.astype(jnp.int32).reshape(n, 1)

    kernel = functools.partial(
        _taylor_ce_kernel, t=t, n_total=n, tile_n=tile_n, chunk_n=chunk_n)

    partials = pl.pallas_call(
        kernel,
        out_shape=jax.ShapeDtypeStruct((num_tiles, 8, 128), jnp.float32),
        grid_spec=pltpu.PrefetchScalarGridSpec(
            num_scalar_prefetch=0,
            grid=(num_tiles,),
            in_specs=[
                pl.BlockSpec((tile_n, c), lambda i: (i, 0)),
                pl.BlockSpec((tile_n, 1), lambda i: (i, 0)),
            ],
            out_specs=pl.BlockSpec((1, 8, 128), lambda i: (i, 0, 0)),
        ),
        compiler_params=pltpu.CompilerParams(
            # Independent per-tile partial sums -> grid axis is truly parallel
            # (both TensorCores on v7x can be used).
            dimension_semantics=("parallel",),
        ),
    )(pred, labels2d)

    # Tiny wrapper-side reduction over one scalar per tile.
    return jnp.sum(partials[:, 0, 0]) / n


def taylor_ce_ref(pred, labels, *, num_classes, t):
    """Pure-JAX reference matching the PyTorch module semantics."""
    prob = jax.nn.softmax(pred.astype(jnp.float32), axis=1)
    prob = jnp.clip(prob, 1e-7, 1.0 - 1e-7)
    one_hot = jax.nn.one_hot(labels, num_classes, dtype=jnp.float32)
    p_y = jnp.sum(prob * one_hot, axis=1).reshape(-1)
    total = jnp.zeros_like(p_y)
    for i in range(1, t + 1):
        total = total + (1.0 - p_y) ** i / i
    return jnp.mean(total)


if __name__ == "__main__":
    NUM_CLASSES = 128   # class axis = lane axis
    T = 3               # Taylor order
    N = 300             # NOT a multiple of the tile -> exercises ragged masking

    key = jax.random.PRNGKey(0)
    kp, kl = jax.random.split(key)
    pred = jax.random.normal(kp, (N, NUM_CLASSES), dtype=jnp.float32)
    labels = jax.random.randint(kl, (N,), 0, NUM_CLASSES, dtype=jnp.int32)

    # Small tiles for the demo (3 tiles, 2 inner chunks each); production
    # callers keep the default tile_n=512 / chunk_n=128.
    loss = taylor_ce(pred, labels, num_classes=NUM_CLASSES, t=T,
                     tile_n=128, chunk_n=64)
    loss = jax.block_until_ready(loss)

    ref = taylor_ce_ref(pred, labels, num_classes=NUM_CLASSES, t=T)
    assert jnp.allclose(loss, ref, rtol=1e-5, atol=1e-5), (loss, ref)

    print("KERNEL_OK")
</pallas_src>

<mosaic_0001>
module attributes {stable_mosaic.version = 11 : i64} {
  func.func @_taylor_ce_kernel(%arg0: i32, %arg1: memref<128x128xf32, #tpu.memory_space<vmem>>, %arg2: memref<128x1xi32, #tpu.memory_space<vmem>>, %arg3: memref<1x8x128xf32, #tpu.memory_space<vmem>>) attributes {dimension_semantics = [#tpu.dimension_semantics<parallel>], iteration_bounds = array<i64: 3>, scalar_prefetch = 0 : i64, scratch_operands = 0 : i64, tpu.core_type = #tpu.core_type<tc>, window_params = [{transform_indices = @transform_0, window_bounds = array<i64: 128, 128>}, {transform_indices = @transform_1, window_bounds = array<i64: 128, 1>}, {transform_indices = @transform_2, window_bounds = array<i64: 1, 8, 128>}]} {
    %c128_i32 = arith.constant 128 : i32
    %0 = arith.muli %arg0, %c128_i32 : i32
    %cst = arith.constant 0.000000e+00 : f32
    %1 = vector.broadcast %cst : f32 to vector<64x1xf32>
    %c0_i32 = arith.constant 0 : i32
    %c64_i32 = arith.constant 64 : i32
    %2 = arith.muli %c0_i32, %c64_i32 : i32
    %3 = tpu.assume_multiple %2, 64 : i32
    %4 = arith.index_cast %3 : i32 to index
    %c0 = arith.constant 0 : index
    %5 = vector.load %arg1[%4, %c0] : memref<128x128xf32, #tpu.memory_space<vmem>>, vector<64x128xf32>
    %6 = arith.index_cast %3 : i32 to index
    %c0_0 = arith.constant 0 : index
    %7 = vector.load %arg2[%6, %c0_0] : memref<128x1xi32, #tpu.memory_space<vmem>>, vector<64x1xi32>
    %cst_1 = arith.constant dense<0xFF800000> : vector<64xf32>
    %8 = vector.multi_reduction <maximumf>, %5, %cst_1 [1] : vector<64x128xf32> to vector<64xf32>
    %9 = vector.shape_cast %8 : vector<64xf32> to vector<64x1xf32>
    %10 = vector.broadcast %9 : vector<64x1xf32> to vector<64x128xf32>
    %11 = arith.subf %5, %10 : vector<64x128xf32>
    %12 = math.exp %11 : vector<64x128xf32>
    %cst_2 = arith.constant dense<0.000000e+00> : vector<64xf32>
    %13 = vector.multi_reduction <add>, %12, %cst_2 [1] : vector<64x128xf32> to vector<64xf32>
    %14 = vector.shape_cast %13 : vector<64xf32> to vector<64x1xf32>
    %15 = tpu.iota {dimensions = array<i32: 1>} : vector<64x128xi32>
    %16 = vector.broadcast %7 : vector<64x1xi32> to vector<64x128xi32>
    %17 = arith.cmpi eq, %15, %16 : vector<64x128xi32>
    %18 = arith.extui %17 : vector<64x128xi1> to vector<64x128xi32>
    %19 = arith.sitofp %18 : vector<64x128xi32> to vector<64x128xf32>
    %20 = arith.mulf %12, %19 : vector<64x128xf32>
    %cst_3 = arith.constant dense<0.000000e+00> : vector<64xf32>
    %21 = vector.multi_reduction <add>, %20, %cst_3 [1] : vector<64x128xf32> to vector<64xf32>
    %22 = vector.shape_cast %21 : vector<64xf32> to vector<64x1xf32>
    %23 = arith.divf %22, %14 : vector<64x1xf32>
    %cst_4 = arith.constant 1.000000e-07 : f32
    %cst_5 = arith.constant 0.99999988 : f32
    %24 = vector.broadcast %cst_4 : f32 to vector<64x1xf32>
    %25 = arith.maximumf %24, %23 : vector<64x1xf32>
    %26 = vector.broadcast %cst_5 : f32 to vector<64x1xf32>
    %27 = arith.minimumf %26, %25 : vector<64x1xf32>
    %cst_6 = arith.constant 1.000000e+00 : f32
    %28 = vector.broadcast %cst_6 : f32 to vector<64x1xf32>
    %29 = arith.subf %28, %27 : vector<64x1xf32>
    %cst_7 = arith.constant 0.000000e+00 : f32
    %30 = vector.broadcast %cst_7 : f32 to vector<64x1xf32>
    %cst_8 = arith.constant 1.000000e+00 : f32
    %31 = vector.broadcast %cst_8 : f32 to vector<64x1xf32>
    %32 = arith.mulf %31, %29 : vector<64x1xf32>
    %cst_9 = arith.constant 1.000000e+00 : f32
    %33 = vector.broadcast %cst_9 : f32 to vector<64x1xf32>
    %34 = arith.mulf %32, %33 : vector<64x1xf32>
    %35 = arith.addf %30, %34 : vector<64x1xf32>
    %36 = arith.mulf %32, %29 : vector<64x1xf32>
    %cst_10 = arith.constant 5.000000e-01 : f32
    %37 = vector.broadcast %cst_10 : f32 to vector<64x1xf32>
    %38 = arith.mulf %36, %37 : vector<64x1xf32>
    %39 = arith.addf %35, %38 : vector<64x1xf32>
    %40 = arith.mulf %36, %29 : vector<64x1xf32>
    %cst_11 = arith.constant 0.333333343 : f32
    %41 = vector.broadcast %cst_11 : f32 to vector<64x1xf32>
    %42 = arith.mulf %40, %41 : vector<64x1xf32>
    %43 = arith.addf %39, %42 : vector<64x1xf32>
    %44 = tpu.iota {dimensions = array<i32: 0>} : vector<64x1xi32>
    %45 = arith.addi %0, %3 : i32
    %46 = vector.broadcast %45 : i32 to vector<64x1xi32>
    %47 = arith.addi %46, %44 : vector<64x1xi32>
    %c300_i32 = arith.constant 300 : i32
    %48 = vector.broadcast %c300_i32 : i32 to vector<64x1xi32>
    %49 = arith.cmpi slt, %47, %48 : vector<64x1xi32>
    %cst_12 = arith.constant 0.000000e+00 : f32
    %50 = vector.broadcast %cst_12 : f32 to vector<64x1xf32>
    %51 = arith.select %49, %43, %50 : vector<64x1xi1>, vector<64x1xf32>
    %52 = arith.addf %1, %51 : vector<64x1xf32>
    %c1_i32 = arith.constant 1 : i32
    %c64_i32_13 = arith.constant 64 : i32
    %53 = arith.muli %c1_i32, %c64_i32_13 : i32
    %54 = tpu.assume_multiple %53, 64 : i32
    %55 = arith.index_cast %54 : i32 to index
    %c0_14 = arith.constant 0 : index
    %56 = vector.load %arg1[%55, %c0_14] : memref<128x128xf32, #tpu.memory_space<vmem>>, vector<64x128xf32>
    %57 = arith.index_cast %54 : i32 to index
    %c0_15 = arith.constant 0 : index
    %58 = vector.load %arg2[%57, %c0_15] : memref<128x1xi32, #tpu.memory_space<vmem>>, vector<64x1xi32>
    %cst_16 = arith.constant dense<0xFF800000> : vector<64xf32>
    %59 = vector.multi_reduction <maximumf>, %56, %cst_16 [1] : vector<64x128xf32> to vector<64xf32>
    %60 = vector.shape_cast %59 : vector<64xf32> to vector<64x1xf32>
    %61 = vector.broadcast %60 : vector<64x1xf32> to vector<64x128xf32>
    %62 = arith.subf %56, %61 : vector<64x128xf32>
    %63 = math.exp %62 : vector<64x128xf32>
    %cst_17 = arith.constant dense<0.000000e+00> : vector<64xf32>
    %64 = vector.multi_reduction <add>, %63, %cst_17 [1] : vector<64x128xf32> to vector<64xf32>
    %65 = vector.shape_cast %64 : vector<64xf32> to vector<64x1xf32>
    %66 = tpu.iota {dimensions = array<i32: 1>} : vector<64x128xi32>
    %67 = vector.broadcast %58 : vector<64x1xi32> to vector<64x128xi32>
    %68 = arith.cmpi eq, %66, %67 : vector<64x128xi32>
    %69 = arith.extui %68 : vector<64x128xi1> to vector<64x128xi32>
    %70 = arith.sitofp %69 : vector<64x128xi32> to vector<64x128xf32>
    %71 = arith.mulf %63, %70 : vector<64x128xf32>
    %cst_18 = arith.constant dense<0.000000e+00> : vector<64xf32>
    %72 = vector.multi_reduction <add>, %71, %cst_18 [1] : vector<64x128xf32> to vector<64xf32>
    %73 = vector.shape_cast %72 : vector<64xf32> to vector<64x1xf32>
    %74 = arith.divf %73, %65 : vector<64x1xf32>
    %cst_19 = arith.constant 1.000000e-07 : f32
    %cst_20 = arith.constant 0.99999988 : f32
    %75 = vector.broadcast %cst_19 : f32 to vector<64x1xf32>
    %76 = arith.maximumf %75, %74 : vector<64x1xf32>
    %77 = vector.broadcast %cst_20 : f32 to vector<64x1xf32>
    %78 = arith.minimumf %77, %76 : vector<64x1xf32>
    %cst_21 = arith.constant 1.000000e+00 : f32
    %79 = vector.broadcast %cst_21 : f32 to vector<64x1xf32>
    %80 = arith.subf %79, %78 : vector<64x1xf32>
    %cst_22 = arith.constant 0.000000e+00 : f32
    %81 = vector.broadcast %cst_22 : f32 to vector<64x1xf32>
    %cst_23 = arith.constant 1.000000e+00 : f32
    %82 = vector.broadcast %cst_23 : f32 to vector<64x1xf32>
    %83 = arith.mulf %82, %80 : vector<64x1xf32>
    %cst_24 = arith.constant 1.000000e+00 : f32
    %84 = vector.broadcast %cst_24 : f32 to vector<64x1xf32>
    %85 = arith.mulf %83, %84 : vector<64x1xf32>
    %86 = arith.addf %81, %85 : vector<64x1xf32>
    %87 = arith.mulf %83, %80 : vector<64x1xf32>
    %cst_25 = arith.constant 5.000000e-01 : f32
    %88 = vector.broadcast %cst_25 : f32 to vector<64x1xf32>
    %89 = arith.mulf %87, %88 : vector<64x1xf32>
    %90 = arith.addf %86, %89 : vector<64x1xf32>
    %91 = arith.mulf %87, %80 : vector<64x1xf32>
    %cst_26 = arith.constant 0.333333343 : f32
    %92 = vector.broadcast %cst_26 : f32 to vector<64x1xf32>
    %93 = arith.mulf %91, %92 : vector<64x1xf32>
    %94 = arith.addf %90, %93 : vector<64x1xf32>
    %95 = tpu.iota {dimensions = array<i32: 0>} : vector<64x1xi32>
    %96 = arith.addi %0, %54 : i32
    %97 = vector.broadcast %96 : i32 to vector<64x1xi32>
    %98 = arith.addi %97, %95 : vector<64x1xi32>
    %c300_i32_27 = arith.constant 300 : i32
    %99 = vector.broadcast %c300_i32_27 : i32 to vector<64x1xi32>
    %100 = arith.cmpi slt, %98, %99 : vector<64x1xi32>
    %cst_28 = arith.constant 0.000000e+00 : f32
    %101 = vector.broadcast %cst_28 : f32 to vector<64x1xf32>
    %102 = arith.select %100, %94, %101 : vector<64x1xi1>, vector<64x1xf32>
    %103 = arith.addf %52, %102 : vector<64x1xf32>
    %c2_i32 = arith.constant 2 : i32
    %104 = vector.shape_cast %103 : vector<64x1xf32> to vector<1x64x1xf32>
    %cst_29 = arith.constant dense<0.000000e+00> : vector<1xf32>
    %105 = vector.multi_reduction <add>, %104, %cst_29 [1, 2] : vector<1x64x1xf32> to vector<1xf32>
    %106 = vector.shape_cast %105 : vector<1xf32> to vector<1x1x1xf32>
    %107 = vector.extract %106[0, 0, 0] : f32 from vector<1x1x1xf32>
    %108 = vector.broadcast %107 : f32 to vector<1x1xf32>
    %109 = vector.shape_cast %108 : vector<1x1xf32> to vector<1x1x1xf32>
    %110 = vector.broadcast %109 : vector<1x1x1xf32> to vector<1x8x128xf32>
    %c0_30 = arith.constant 0 : index
    %c0_31 = arith.constant 0 : index
    %c0_32 = arith.constant 0 : index
    %111 = vector.load %arg3[%c0_30, %c0_31, %c0_32] : memref<1x8x128xf32, #tpu.memory_space<vmem>>, vector<1x8x128xf32>
    tpu.vector_store %arg3[%c0_30, %c0_31, %c0_32], %110 {strides = array<i32>} : memref<1x8x128xf32, #tpu.memory_space<vmem>>, vector<1x8x128xf32>,
    return
  }
  func.func @transform_0(%arg0: i32) -> (i32, i32) {
    %c0_i32 = arith.constant 0 : i32
    %c0_i32_0 = arith.constant 0 : i32
    return %arg0, %c0_i32 : i32, i32
  }
  func.func @transform_1(%arg0: i32) -> (i32, i32) {
    %c0_i32 = arith.constant 0 : i32
    %c0_i32_0 = arith.constant 0 : i32
    return %arg0, %c0_i32 : i32, i32
  }
  func.func @transform_2(%arg0: i32) -> (i32, i32, i32) {
    %c0_i32 = arith.constant 0 : i32
    %c0_i32_0 = arith.constant 0 : i32
    %c0_i32_1 = arith.constant 0 : i32
    return %arg0, %c0_i32, %c0_i32_0 : i32, i32, i32
  }
}

</mosaic_0001>

<bundles_post_ra>
// kernel: tpu_custom_call.1
= control target key start
LH: loop header
LB: loop body
LE: loop exit
PB: predicated region body
PF: predicated region fallthrough
CT: control target
= control target key end

     0   :  { %7 = vsyncpa [#allocation3], 0  ;;  %s2181_s0 = inlined_call_operand.vmem [shape: f32[300,128], index: 0, kind: input, shape index: {}]   ;;  %s2182_s1 = inlined_call_operand.vmem [shape: s32[300,1], index: 1, kind: input, shape index: {}]   ;;  %s2183_s2 = inlined_call_operand.hbm [shape: f32[3,8,128], index: 2, kind: output, shape index: {}]  }
   0x1   :  { %9 = vsyncpa [#allocation3 + $0x1], 0  ;;  %s1327_s9 = smov 0   ;;  %s1329_s10 = smov 0  }
   0x2   :  { %s1331_s11 = smov 0   ;;  %s1333_s12 = smov 0  }
   0x3 LB: > { %s1348_s13 = sadd.s32 4294967295, %s1308_s12   ;;  %s1090_s14 = sadd.s32 4294967294, %s1308_s12   ;;  %s1308_s12 = sphi %s1333_s12, %s2241_s12   ;;  %s1304_s11 = sphi %s1331_s11, %s2240_s11   ;;  %s1300_s10 = sphi %s1329_s10, %s2239_s10   ;;  %s1296_s9 = sphi %s1327_s9, %s2238_s9  }
   0x4   : > { %s1352_s15 = sadd.s32 1, %s1308_s12   ;;  %s74_s16 = sadd.s32 1, %s1304_s11 }
   0x5   : > { %s71_s17 = ssub.s32 %s1308_s12, %s1352_s15  ;;  %p84_p0 = scmp.ne.s32.totalorder %s1304_s11, %s1300_s10 }
   0x6   : > { %p72_p1 = scmp.eq.s32.totalorder %s71_s17, 0  ;;  %p85_p2 = scmp.eq.s32.totalorder %s1348_s13, 2 }
   0x7   : > { %p90_p3 = scmp.ne.s32.totalorder %s1300_s10, %s1296_s9  ;;  %p91_p4 = scmp.eq.s32.totalorder %s1090_s14, 2 }
   0x8   : > { %s1363_s18 = scalar_select %p72_p1, %s1304_s11, %s74_s16  }
   0x9   : > { %p1365_p5 = por %p85_p2, %p84_p0  ;;  %p1369_p6 = por %p91_p4, %p90_p3 }
   0xa   : > { %p1093_p7 = scmp.ge.s32.totalorder %s1308_s12, 1  ;;  %p143_p8 = scmp.lt.s32.totalorder %s1308_s12, 4 }
   0xc   : > { %p144_p9 = pnand %p1093_p7, %p143_p8 }
   0xd   : > { %s1095_s21 = sshll.u32 (!%p144_p9), %s1348_s13, 4  ;;  %s1099_s29 = sshll.u32 (!%p144_p9), %s1348_s13, 7 }
   0xe   : > { %147 = sbr.rel (%p144_p9) target bundleno = 584 (0x248), region = 28  ;;  %p183_p10 = scmp.lt.s32.totalorder (!%p144_p9), %s1095_s21, 37 }
   0xf   : > { %s942_s30 = sadd.s32 (!%p144_p9), 64, %s1099_s29  ;;  %s175_s3 = sand.u32 (!%p144_p9), 1, %s1300_s10  }
  0x10   : > { %s1094_s4 = sshll.u32 (!%p144_p9), %s175_s3, 3  ;;  %s1133_s5 = sshll.u32 (!%p144_p9), %s1348_s13, 3 }
  0x11   : > { %s1014_s8 = scalar_lea.hbm (!%p144_p9), %s2183_s2, %s1133_s5  ;;  %s177_s14 = scalar_lea.vmem (!%p144_p9), [#allocation2], %s1094_s4 }
  0x12   : > { %s1016_s16 = sshll.u32 (!%p144_p9), %s177_s14, 4  ;;  %s1018_s17 = sshll.u32 (!%p144_p9), %s1014_s8, 4  ;;  %s1017_s16 = int_to_ptr.vmem [resolvable:$true] %s1016_s16  ;;  %s1019_s17 = int_to_ptr.hbm [resolvable:$true] %s1018_s17 }
  0x13   : > { %s2243_s21 = smov (!%p183_p10, %s1095_s21), 37  ;;  %v1310_v6 = vmov 0   ;;  %s1260_s23 = sshra.s32 %s1019_s17, 4  ;;  %s1261_s23 = int_to_ptr.hbm [resolvable:$true] %s1260_s23 }
  0x14   : > { %s1096_s22 = sshll.u32 %s2243_s21, 3  ;;  %1179 = vset.pattern.permute.xlu2 %v1310_v6  ;;  %1180 = vset.pattern.permute.xlu0 %v1310_v6  ;;  %s1262_s24 = scalar_lea.hbm %s1261_s23, 8 }
  0x15   : > { %s1384_s25 = scalar_lea.vmem %s2181_s0, %s1096_s22  ;;  %1181 = vset.pattern.permute.xlu1 %v1310_v6  ;;  %s200_s28 = scalar_lea.vmem %s2182_s1, %s1096_s22 }
  0x16   : > { %v1387_v0 = vld [vmem:[%s1384_s25 + $0x20] sm:$0xff]  ;;  %v1390_v1 = vld [vmem:[%s1384_s25 + $0x10] sm:$0xff]  ;;  %v1399_v3 = vld [vmem:[%s1384_s25 + $0x28] sm:$0xff]  ;;  %s1004_s22 = scalar_lea.sflag [#allocation3], %s175_s3  ;;  %p1263_p11 = scmp.ne.s32.totalorder %s1261_s23, %s1262_s24 }
  0x17   : > { %v1393_v2 = vld [vmem:[%s1384_s25] sm:$0xff]  ;;  %231 = vmax.xlane.f32.xlu2 %v1387_v0  ;;  %227 = vmax.xlane.f32.xlu1 %v1390_v1  ;;  %v1402_v4 = vld [vmem:[%s1384_s25 + $0x18] sm:$0xff]  ;;  %v1405_v5 = vld [vmem:[%s1384_s25 + $0x8] sm:$0xff]  ;;  %s1266_s26 = scalar_lea.hbm %s2183_s2, 24  ;;  %p1267_p0 = scmp.lt.s32.totalorder %s1261_s23, %s2183_s2 }
  0x18   : > { %223 = vmax.xlane.f32.xlu0 %v1393_v2  ;;  %v1411_v7 = vld [vmem:[%s1384_s25 + $0x50] sm:$0xff]  ;;  %v1414_v8 = vld [vmem:[%s1384_s25 + $0x38] sm:$0xff]  ;;  %v1423_v10 = vld [vmem:[%s1384_s25 + $0x68] sm:$0xff]  ;;  %p1264_p12 = pnand %p1263_p11, %p1365_p5  ;;  %p1268_p1 = scmp.lt.s32.totalorder %s1266_s26, %s1262_s24 }
  0x19   : > { %v1417_v9 = vld [vmem:[%s1384_s25 + $0x30] sm:$0xff]  ;;  %v1426_v11 = vld [vmem:[%s1384_s25 + $0x48] sm:$0xff]  ;;  %v1429_v12 = vld [vmem:[%s1384_s25 + $0x40] sm:$0xff] }
  0x1a   : > { %v1435_v13 = vld [vmem:[%s1384_s25 + $0x60] sm:$0xff]  ;;  %v1438_v14 = vld [vmem:[%s1384_s25 + $0x58] sm:$0xff]  ;;  %v1446_v16 = vld [vmem:[%s1384_s25 + $0x70] sm:$0xff]  ;;  %p1265_p13 = pneg %p1264_p12  ;;  %p1269_p2 = por %p1268_p1, %p1267_p0 }
  0x1b   : > { %v1443_v15 = vld [vmem:[%s1384_s25 + $0x78] sm:$0xff]  ;;  %v215_v17 = vld [vmem:[%s200_s28] sm:$0xff]  ;;  %v1117_v18 = vld [vmem:[%s200_s28 + $0x48] sm:$0xff] }
  0x1c   : > { %v216_v19 = vld [vmem:[%s200_s28 + $0x8] sm:$0xff]  ;;  %v217_v20 = vld [vmem:[%s200_s28 + $0x10] sm:$0xff]  ;;  %v1116_v21 = vld [vmem:[%s200_s28 + $0x40] sm:$0xff]  ;;  %p1270_p3 = pnand %p1269_p2, %p1265_p13 }
  0x1d   : > { %v219_v22 = vld [vmem:[%s200_s28 + $0x20] sm:$0xff]  ;;  %v218_v23 = vld [vmem:[%s200_s28 + $0x18] sm:$0xff]  ;;  %v1118_v24 = vld [vmem:[%s200_s28 + $0x50] sm:$0xff] }
  0x1e   : > { %v1121_v25 = vld [vmem:[%s200_s28 + $0x68] sm:$0xff]  ;;  %v1120_v26 = vld [vmem:[%s200_s28 + $0x60] sm:$0xff]  ;;  %v1119_v27 = vld [vmem:[%s200_s28 + $0x58] sm:$0xff] }
  0x1f   : > { %233 = vmax.xlane.f32.xlu2 %v1399_v3  ;;  %229 = vmax.xlane.f32.xlu1 %v1402_v4  ;;  %v222_v28 = vld [vmem:[%s200_s28 + $0x38] sm:$0xff]  ;;  %v221_v29 = vld [vmem:[%s200_s28 + $0x30] sm:$0xff]  ;;  %v220_v30 = vld [vmem:[%s200_s28 + $0x28] sm:$0xff] }
  0x20   : > { %225 = vmax.xlane.f32.xlu0 %v1405_v5  ;;  %v1123_v31 = vld [vmem:[%s200_s28 + $0x78] sm:$0xff]  ;;  %v1122_v32 = vld [vmem:[%s200_s28 + $0x70] sm:$0xff] }
  0x27   : > { %618 = vmax.xlane.f32.xlu2 %v1411_v7  ;;  %237 = vmax.xlane.f32.xlu1 %v1414_v8 }
  0x28   : > { %235 = vmax.xlane.f32.xlu0 %v1417_v9 }
  0x2f   : > { %624 = vmax.xlane.f32.xlu2 %v1423_v10  ;;  %616 = vmax.xlane.f32.xlu1 %v1426_v11 }
  0x30   : > { %614 = vmax.xlane.f32.xlu0 %v1429_v12 }
  0x37   : > { %622 = vmax.xlane.f32.xlu1 %v1435_v13 }
  0x38   : > { %620 = vmax.xlane.f32.xlu0 %v1438_v14 }
  0x3f   : > { %628 = vmax.xlane.f32.xlu1 %v1443_v15 }
  0x40   : > { %626 = vmax.xlane.f32.xlu0 %v1446_v16 }
  0x47   : > { %282 = vperm.xlu2 %1179, %v215_v17  }
  0x4f   : > { %674 = vperm.xlu2 %1179, %v1117_v18  }
  0x54   : > { %285 = vperm.xlu0 %1180, %v216_v19  }
  0x57   : > { %288 = vperm.xlu2 %1179, %v217_v20  }
  0x58   : > { %671 = vperm.xlu1 %1181, %v1116_v21  }
  0x5c   : > { %294 = vperm.xlu0 %1180, %v219_v22  }
  0x5f   : > { %291 = vperm.xlu2 %1179, %v218_v23  }
  0x60   : > { %677 = vperm.xlu1 %1181, %v1118_v24  }
  0x64   : > { %686 = vperm.xlu0 %1180, %v1121_v25  }
  0x67   : > { %683 = vperm.xlu2 %1179, %v1120_v26  }
  0x68   : > { %680 = vperm.xlu1 %1181, %v1119_v27  }
  0x6c   : > { %303 = vperm.xlu0 %1180, %v222_v28  }
  0x6f   : > { %300 = vperm.xlu2 %1179, %v221_v29  }
  0x70   : > { %297 = vperm.xlu1 %1181, %v220_v30  }
  0x77   : > { %692 = vperm.xlu2 %1179, %v1123_v31  }
  0x78   : > { %689 = vperm.xlu1 %1181, %v1122_v32  }
  0x8a   : > { %v232_v33 = vpop.xlane.xlu2 %231  ;;  %v228_v34 = vpop.xlane.xlu1 %227 }
  0x8b   : > { %v224_v35 = vpop.xlane.xlu0 %223  ;;  %v241_v38 = vsub.f32 %v1390_v1, %v228_v34  ;;  %v243_v63 = vsub.f32 %v1387_v0, %v232_v33 }
  0x8c   : > { %v239_v36 = vsub.f32 %v1393_v2, %v224_v35 }
  0x8d   : > { %v251_v44 = vmul.f32 1.442695, %v241_v38 }
  0x8e   : > { %v247_v41 = vmul.f32 1.442695, %v239_v36 }
  0x90   : > { %1182 = vpow2.f32 %v247_v41 }
  0x92   : > { %v230_v37 = vpop.xlane.xlu1 %229  ;;  %v234_v39 = vpop.xlane.xlu2 %233 }
  0x93   : > { %v226_v40 = vpop.xlane.xlu0 %225  ;;  %v242_v45 = vsub.f32 %v1402_v4, %v230_v37  ;;  %v244_v19 = vsub.f32 %v1399_v3, %v234_v39 }
  0x94   : > { %v240_v42 = vsub.f32 %v1405_v5, %v226_v40  ;;  %v1311_v40 = vmov 0.0  }
  0x95   : > { %v253_v48 = vmul.f32 1.442695, %v242_v45  ;;  %v257_v20 = vmul.f32 1.442695, %v244_v19 }
  0x96   : > { %v249_v43 = vmul.f32 1.442695, %v240_v42  ;;  %v1461_v50 = vpop.eup %1182 }
  0x98   : > { %1184 = vpow2.f32 %v249_v43 }
  0x99   : > { %1186 = vpow2.f32 %v251_v44 }
  0x9a   : > { %v1459_v46 = vpop.xlane.xlu1 %237  ;;  %v619_v49 = vpop.xlane.xlu2 %618  ;;  %1188 = vpow2.f32 %v253_v48 }
  0x9b   : > { %v236_v47 = vpop.xlane.xlu0 %235  ;;  %v632_v52 = vsub.f32 %v1411_v7, %v619_v49  ;;  %v255_v7 = vmul.f32 1.442695, %v243_v63  ;;  %v246_v27 = vsub.f32 %v1414_v8, %v1459_v46 }
  0x9c   : > { %v245_v0 = vsub.f32 %v1417_v9, %v236_v47 }
  0x9d   : > { %v642_v55 = vmul.f32 1.442695, %v632_v52  ;;  %v261_v32 = vmul.f32 1.442695, %v246_v27 }
  0x9e   : > { %v1463_v51 = vpop.eup %1184  ;;  %v259_v21 = vmul.f32 1.442695, %v245_v0 }
  0x9f   : > { %265 = vadd.xlane.f32.xlu0 %v1463_v51  ;;  %v1468_v53 = vpop.eup %1186  ;;  %1190 = vpow2.f32 %v642_v55 }
  0xa0   : > { %263 = vadd.xlane.f32.xlu2 %v1461_v50  ;;  %v1473_v61 = vpop.eup %1188 }
  0xa2   : > { %267 = vadd.xlane.f32.xlu1 %v1468_v53  ;;  %v617_v54 = vpop.xlane.xlu1 %616  ;;  %v625_v62 = vpop.xlane.xlu2 %624 }
  0xa3   : > { %v631_v56 = vsub.f32 %v1426_v11, %v617_v54  ;;  %v615_v57 = vpop.xlane.xlu0 %614 }
  0xa4   : > { %v630_v58 = vsub.f32 %v1429_v12, %v615_v57 }
  0xa5   : > { %v640_v59 = vmul.f32 1.442695, %v631_v56  ;;  %v1479_v6 = vpop.eup %1190 }
  0xa6   : > { %v638_v60 = vmul.f32 1.442695, %v630_v58 }
  0xa7   : > { %1192 = vpow2.f32 %v640_v59 }
  0xa8   : > { %269 = vadd.xlane.f32.xlu2 %v1473_v61  ;;  %1194 = vpow2.f32 %v638_v60 }
  0xaa   : > { %v623_v1 = vpop.xlane.xlu1 %622 }
  0xab   : > { %v634_v2 = vsub.f32 %v1435_v13, %v623_v1  ;;  %v621_v4 = vpop.xlane.xlu0 %620  ;;  %v635_v13 = vsub.f32 %v1423_v10, %v625_v62 }
  0xac   : > { %v633_v5 = vsub.f32 %v1438_v14, %v621_v4  ;;  %v283_v14 = vpop.permute.xlu2 %282 }
  0xad   : > { %v646_v11 = vmul.f32 1.442695, %v634_v2  ;;  %v1481_v12 = vpop.eup %1192  ;;  %v648_v24 = vmul.f32 1.442695, %v635_v13 }
  0xae   : > { %v644_v17 = vmul.f32 1.442695, %v633_v5  ;;  %v1195_v18 = vpop.eup %1194  ;;  %656 = vadd.xlane.f32.xlu0 %v1481_v12 }
  0xaf   : > { %1196 = vpow2.f32 %v646_v11  ;;  %654 = vadd.xlane.f32.xlu1 %v1195_v18 }
  0xb0   : > { %1198 = vpow2.f32 %v644_v17  ;;  %658 = vadd.xlane.f32.xlu2 %v1479_v6 }
  0xb1   : > { %1200 = vpow2.f32 %v255_v7 }
  0xb2   : > { %v629_v3 = vpop.xlane.xlu1 %628  ;;  %1202 = vpow2.f32 %v257_v20 }
  0xb3   : > { %v627_v22 = vpop.xlane.xlu0 %626  ;;  %1204 = vpow2.f32 %v259_v21  ;;  %v637_v10 = vsub.f32 %v1443_v15, %v629_v3  ;;  %v279_v15 = vlaneseq }
  0xb4   : > { %v636_v9 = vsub.f32 %v1446_v16, %v627_v22  ;;  %1206 = vpow2.f32 %v648_v24  ;;  %v675_v28 = vpop.permute.xlu2 %674 }
  0xb5   : > { %v1488_v23 = vpop.eup %1196  ;;  %v652_v30 = vmul.f32 1.442695, %v637_v10  ;;  %v1511_v8 = vand.u32 127, %v279_v15 }
  0xb6   : > { %v1490_v25 = vpop.eup %1198  ;;  %662 = vadd.xlane.f32.xlu0 %v1488_v23  ;;  %v650_v29 = vmul.f32 1.442695, %v636_v9 }
  0xb7   : > { %v1492_v26 = vpop.eup %1200  ;;  %660 = vadd.xlane.f32.xlu1 %v1490_v25  ;;  %vm305_vm0 = vcmp.eq.s32.totalorder %v1511_v8, %v283_v14  ;;  %vm695_vm3 = vcmp.eq.s32.totalorder %v1511_v8, %v675_v28 }
  0xb8   : > { %271 = vadd.xlane.f32.xlu2 %v1492_v26  ;;  %v1501_v31 = vpop.eup %1202  ;;  %1208 = vpow2.f32 %v650_v29  ;;  %v1100_v41 = vsel %vm305_vm0, 1.0, %v1311_v40  ;;  %v1125_v52 = vsel %vm695_vm3, 1.0, %v1311_v40 }
  0xb9   : > { %v1503_v33 = vpop.eup %1204  ;;  %1210 = vpow2.f32 %v652_v30  ;;  %v329_v45 = vmul.f32 %v1461_v50, %v1100_v41  ;;  %v719_v55 = vmul.f32 %v1481_v12, %v1125_v52 }
  0xba   : > { %v1505_v16 = vpop.eup %1206  ;;  %1212 = vpow2.f32 %v261_v32 }
  0xbc   : > { %v289_v35 = vpop.permute.xlu2 %288 }
  0xbd   : > { %vm307_vm4 = vcmp.eq.s32.totalorder %v1511_v8, %v289_v35 }
  0xbe   : > { %275 = vadd.xlane.f32.xlu0 %v1503_v33  ;;  %v1513_v34 = vpop.eup %1208  ;;  %v1102_v54 = vsel %vm307_vm4, 1.0, %v1311_v40 }
  0xbf   : > { %273 = vadd.xlane.f32.xlu1 %v1501_v31  ;;  %v1515_v36 = vpop.eup %1210  ;;  %v331_v56 = vmul.f32 %v1468_v53, %v1102_v54 }
  0xc0   : > { %664 = vadd.xlane.f32.xlu2 %v1505_v16  ;;  %v1517_v38 = vpop.eup %1212 }
  0xc4   : > { %v292_v47 = vpop.permute.xlu2 %291 }
  0xc5   : > { %vm308_vm7 = vcmp.eq.s32.totalorder %v1511_v8, %v292_v47 }
  0xc6   : > { %v286_v37 = vpop.permute.xlu0 %285  ;;  %668 = vadd.xlane.f32.xlu0 %v1515_v36  ;;  %v1103_v62 = vsel %vm308_vm7, 1.0, %v1311_v40 }
  0xc7   : > { %vm306_vm1 = vcmp.eq.s32.totalorder %v1511_v8, %v286_v37  ;;  %666 = vadd.xlane.f32.xlu1 %v1513_v34  ;;  %v332_v2 = vmul.f32 %v1473_v61, %v1103_v62 }
  0xc8   : > { %277 = vadd.xlane.f32.xlu2 %v1517_v38  ;;  %v1101_v42 = vsel %vm306_vm1, 1.0, %v1311_v40 }
  0xc9   : > { %v330_v46 = vmul.f32 %v1463_v51, %v1101_v42 }
  0xca   : > { %v672_v39 = vpop.permute.xlu1 %671 }
  0xcb   : > { %vm694_vm2 = vcmp.eq.s32.totalorder %v1511_v8, %v672_v39 }
  0xcc   : > { %v1124_v43 = vsel %vm694_vm2, 1.0, %v1311_v40  ;;  %v684_v57 = vpop.permute.xlu2 %683 }
  0xcd   : > { %v718_v44 = vmul.f32 %v1195_v18, %v1124_v43  ;;  %vm698_vm10 = vcmp.eq.s32.totalorder %v1511_v8, %v684_v57 }
  0xce   : > { %v295_v48 = vpop.permute.xlu0 %294 }
  0xcf   : > { %726 = vadd.xlane.f32.xlu0 %v718_v44  ;;  %337 = vadd.xlane.f32.xlu1 %v329_v45  ;;  %vm309_vm6 = vcmp.eq.s32.totalorder %v1511_v8, %v295_v48 }
  0xd0   : > { %339 = vadd.xlane.f32.xlu2 %v330_v46  ;;  %v1104_v58 = vsel %vm309_vm6, 1.0, %v1311_v40 }
  0xd1   : > { %v333_v53 = vmul.f32 %v1492_v26, %v1104_v58 }
  0xd2   : > { %v678_v49 = vpop.permute.xlu1 %677 }
  0xd3   : > { %vm696_vm5 = vcmp.eq.s32.totalorder %v1511_v8, %v678_v49 }
  0xd4   : > { %v1126_v50 = vsel %vm696_vm5, 1.0, %v1311_v40  ;;  %v301_v7 = vpop.permute.xlu2 %300 }
  0xd5   : > { %v720_v51 = vmul.f32 %v1479_v6, %v1126_v50  ;;  %v1128_v6 = vsel %vm698_vm10, 1.0, %v1311_v40  ;;  %vm311_vm13 = vcmp.eq.s32.totalorder %v1511_v8, %v301_v7 }
  0xd6   : > { %v687_v59 = vpop.permute.xlu0 %686  ;;  %v722_v18 = vmul.f32 %v1488_v23, %v1128_v6  ;;  %v1106_v13 = vsel %vm311_vm13, 1.0, %v1311_v40 }
  0xd7   : > { %730 = vadd.xlane.f32.xlu0 %v720_v51  ;;  %728 = vadd.xlane.f32.xlu1 %v719_v55  ;;  %vm699_vm9 = vcmp.eq.s32.totalorder %v1511_v8, %v687_v59  ;;  %v335_v23 = vmul.f32 %v1503_v33, %v1106_v13 }
  0xd8   : > { %341 = vadd.xlane.f32.xlu2 %v331_v56  ;;  %v1129_v4 = vsel %vm699_vm9, 1.0, %v1311_v40 }
  0xd9   : > { %v723_v61 = vmul.f32 %v1505_v16, %v1129_v4 }
  0xda   : > { %v681_v60 = vpop.permute.xlu1 %680 }
  0xdb   : > { %vm697_vm8 = vcmp.eq.s32.totalorder %v1511_v8, %v681_v60 }
  0xdc   : > { %v1127_v63 = vsel %vm697_vm8, 1.0, %v1311_v40  ;;  %v693_v20 = vpop.permute.xlu2 %692 }
  0xdd   : > { %v721_v1 = vmul.f32 %v1490_v25, %v1127_v63  ;;  %vm701_vm15 = vcmp.eq.s32.totalorder %v1511_v8, %v693_v20 }
  0xde   : > { %v304_v11 = vpop.permute.xlu0 %303  ;;  %v1131_v24 = vsel %vm701_vm15, 1.0, %v1311_v40 }
  0xdf   : > { %345 = vadd.xlane.f32.xlu0 %v333_v53  ;;  %343 = vadd.xlane.f32.xlu1 %v332_v2  ;;  %vm312_vm12 = vcmp.eq.s32.totalorder %v1511_v8, %v304_v11  ;;  %v725_v3 = vmul.f32 %v1515_v36, %v1131_v24 }
  0xe0   : > { %732 = vadd.xlane.f32.xlu2 %v721_v1  ;;  %v1107_v19 = vsel %vm312_vm12, 1.0, %v1311_v40 }
  0xe1   : > { %v336_v21 = vmul.f32 %v1517_v38, %v1107_v19  ;;  %v1661_v19 = vshrl.u32 %v279_v15, 7 }
  0xe2   : > { %v298_v5 = vpop.permute.xlu1 %297 }
  0xe3   : > { %vm310_vm11 = vcmp.eq.s32.totalorder %v1511_v8, %v298_v5 }
  0xe4   : > { %v1105_v12 = vsel %vm310_vm11, 1.0, %v1311_v40 }
  0xe5   : > { %v334_v17 = vmul.f32 %v1501_v31, %v1105_v12 }
  0xe7   : > { %736 = vadd.xlane.f32.xlu0 %v723_v61  ;;  %734 = vadd.xlane.f32.xlu1 %v722_v18 }
  0xe8   : > { %347 = vadd.xlane.f32.xlu2 %v334_v17 }
  0xea   : > { %v690_v0 = vpop.permute.xlu1 %689 }
  0xeb   : > { %vm700_vm14 = vcmp.eq.s32.totalorder %v1511_v8, %v690_v0 }
  0xec   : > { %v1130_v14 = vsel %vm700_vm14, 1.0, %v1311_v40 }
  0xed   : > { %v724_v22 = vmul.f32 %v1513_v34, %v1130_v14  ;;  %v1669_v14 = vstv %s1099_s29 }
  0xef   : > { %351 = vadd.xlane.f32.xlu0 %v336_v21  ;;  %349 = vadd.xlane.f32.xlu1 %v335_v23 }
  0xf0   : > { %738 = vadd.xlane.f32.xlu2 %v724_v22 }
  0xf7   : > { %740 = vadd.xlane.f32.xlu1 %v725_v3 }
 0x112   : > { %v266_v25 = vpop.xlane.xlu0 %265 }
 0x113   : > { %v264_v26 = vpop.xlane.xlu2 %263  ;;  %1214 = vrcp.f32 %v266_v25  ;;  %v377_v42 = vand.u32 2147483647, %v266_v25  ;;  %v379_v43 = vand.u32 2147483648, %v266_v25  ;;  %vm373_vm4 = vweird.f32 %v266_v25 }
 0x114   : > { %1216 = vrcp.f32 %v264_v26  ;;  %v362_v40 = vand.u32 2147483647, %v264_v26  ;;  %v364_v41 = vand.u32 2147483648, %v264_v26  ;;  %vm358_vm0 = vweird.f32 %v264_v26 }
 0x115   : > { %v1569_v9 = vpop.xlane.xlu1 %267  ;;  %vm1614_vm6 = vcmp.eq.f32.partialorder %v377_v42, 8.507059e+37  ;;  %v380_v55 = vor.u32 1.1754944e-38, %v379_v43 }
 0x116   : > { %1218 = vrcp.f32 %v1569_v9  ;;  %v394_v44 = vand.u32 2147483648, %v1569_v9  ;;  %vm1606_vm3 = vcmp.eq.f32.partialorder %v362_v40, 8.507059e+37  ;;  %v365_v54 = vor.u32 1.1754944e-38, %v364_v41 }
 0x117   : > { %vm388_vm7 = vweird.f32 %v1569_v9  ;;  %v392_v56 = vand.u32 2147483647, %v1569_v9 }
 0x118   : > { %v1620_v57 = vor.u32 1.1754944e-38, %v394_v44 }
 0x119   : > { %v1572_v10 = vpop.eup %1214  ;;  %vm1672_vm11 = vcmp.eq.f32.partialorder %v392_v56, 8.507059e+37 }
 0x11a   : > { %v1574_v27 = vpop.eup %1216  ;;  %v369_v28 = vmul.f32 %v1572_v10, %v266_v25  ;;  %vm374_vm1 = vweird.f32 %v1572_v10 }
 0x11b   : > { %v1577_v29 = vpop.xlane.xlu2 %269  ;;  %v354_v30 = vmul.f32 %v1574_v27, %v264_v26  ;;  %vm359_vm2 = vweird.f32 %v1574_v27  ;;  %vm1610_vm5 = vmor %vm373_vm4, %vm374_vm1 }
 0x11c   : > { %1220 = vrcp.f32 %v1577_v29  ;;  %v370_v31 = vsub.f32 1.0, %v369_v28  ;;  %v1581_v33 = vpop.eup %1218  ;;  %v409_v45 = vand.u32 2147483648, %v1577_v29  ;;  %vm1625_vm8 = vmor %vm358_vm0, %vm359_vm2  ;;  %vm403_vm10 = vweird.f32 %v1577_v29 }
 0x11d   : > { %v355_v32 = vsub.f32 1.0, %v354_v30  ;;  %v384_v8 = vmul.f32 %v1581_v33, %v1569_v9  ;;  %vm389_vm9 = vweird.f32 %v1581_v33  ;;  %v407_v60 = vand.u32 2147483647, %v1577_v29 }
 0x11e   : > { %v371_v36 = vmul.f32 %v1572_v10, %v370_v31  ;;  %v1632_v62 = vor.u32 1.1754944e-38, %v409_v45  ;;  %vm1713_vm2 = vmor %vm388_vm7, %vm389_vm9 }
 0x11f   : > { %v356_v35 = vmul.f32 %v1574_v27, %v355_v32  ;;  %v385_v46 = vsub.f32 1.0, %v384_v8  ;;  %vm1682_vm12 = vcmp.eq.f32.partialorder %v407_v60, 8.507059e+37 }
 0x120   : > { %v372_v48 = vadd.f32 %v1572_v10, %v371_v36 }
 0x121   : > { %v1587_v34 = vpop.xlane.xlu0 %656  ;;  %v357_v47 = vadd.f32 %v1574_v27, %v356_v35  ;;  %v386_v5 = vmul.f32 %v1581_v33, %v385_v46 }
 0x122   : > { %v1583_v16 = vpop.eup %1220  ;;  %v1593_v38 = vpop.xlane.xlu1 %654  ;;  %1222 = vrcp.f32 %v1587_v34  ;;  %v376_v4 = vsel %vm1610_vm5, %v1572_v10, %v372_v48  ;;  %v768_v20 = vand.u32 2147483648, %v1587_v34  ;;  %vm762_vm13 = vweird.f32 %v1587_v34 }
 0x123   : > { %v399_v37 = vmul.f32 %v1583_v16, %v1577_v29  ;;  %v1596_v39 = vpop.xlane.xlu2 %658  ;;  %1224 = vrcp.f32 %v1593_v38  ;;  %v361_v2 = vsel %vm1625_vm8, %v1574_v27, %v357_v47  ;;  %v753_v61 = vand.u32 2147483648, %v1593_v38 }
 0x124   : > { %1226 = vrcp.f32 %v1596_v39  ;;  %v751_v0 = vand.u32 2147483647, %v1593_v38  ;;  %v1678_v15 = vsel %vm1606_vm3, %v365_v54, %v361_v2  ;;  %v783_v23 = vand.u32 2147483648, %v1596_v39 }
 0x125   : > { %v400_v49 = vsub.f32 1.0, %v399_v37  ;;  %v387_v24 = vadd.f32 %v1581_v33, %v386_v5  ;;  %v1686_v25 = vor.u32 1.1754944e-38, %v753_v61  ;;  %v1690_v26 = vsel %vm1614_vm6, %v380_v55, %v376_v4 }
 0x126   : > { %vm404_vm14 = vweird.f32 %v1583_v16  ;;  %v1697_v27 = vadd.s32 %v1669_v14, %v1661_v19  ;;  %vm747_vm15 = vweird.f32 %v1593_v38  ;;  %v766_v30 = vand.u32 2147483647, %v1587_v34 }
 0x127   : > { %v401_v17 = vmul.f32 %v1583_v16, %v400_v49  ;;  %v781_v31 = vand.u32 2147483647, %v1596_v39  ;;  %v1707_v35 = vor.u32 1.1754944e-38, %v768_v20  ;;  %v1723_v42 = vor.u32 1.1754944e-38, %v783_v23  ;;  %vm1732_vm4 = vmor %vm403_vm10, %vm404_vm14 }
 0x128   : > { %v1622_v58 = vpop.eup %1222  ;;  %v391_v43 = vsel %vm1713_vm2, %v1581_v33, %v387_v24  ;;  %vm777_vm5 = vweird.f32 %v1596_v39  ;;  %vm1760_vm6 = vcmp.eq.f32.partialorder %v751_v0, 8.507059e+37  ;;  %vm1764_vm7 = vcmp.eq.f32.partialorder %v766_v30, 8.507059e+37 }
 0x129   : > { %v1634_v63 = vpop.eup %1224  ;;  %v758_v53 = vmul.f32 %v1622_v58, %v1587_v34  ;;  %v1638_v1 = vpop.xlane.xlu0 %662  ;;  %v402_v10 = vadd.f32 %v1583_v16, %v401_v17  ;;  %vm763_vm1 = vweird.f32 %v1622_v58  ;;  %v1773_v60 = vsel %vm1672_vm11, %v1620_v57, %v391_v43 }
 0x12a   : > { %v1648_v6 = vpop.eup %1226  ;;  %v743_v7 = vmul.f32 %v1634_v63, %v1593_v38  ;;  %v1652_v11 = vpop.xlane.xlu1 %660  ;;  %1228 = vrcp.f32 %v1638_v1  ;;  %vm748_vm0 = vweird.f32 %v1634_v63  ;;  %vm1778_vm9 = vcmp.eq.f32.partialorder %v781_v31, 8.507059e+37  ;;  %vm1793_vm11 = vmor %vm762_vm13, %vm763_vm1 }
 0x12b   : > { %v1655_v12 = vpop.xlane.xlu2 %271  ;;  %v759_v18 = vsub.f32 1.0, %v758_v53  ;;  %1230 = vrcp.f32 %v1652_v11  ;;  %v773_v13 = vmul.f32 %v1648_v6, %v1596_v39  ;;  %vm778_vm3 = vweird.f32 %v1648_v6 }
 0x12c   : > { %1232 = vrcp.f32 %v1655_v12  ;;  %v744_v22 = vsub.f32 1.0, %v743_v7  ;;  %v406_v29 = vsel %vm1732_vm4, %v1583_v16, %v402_v10  ;;  %v422_v33 = vand.u32 2147483647, %v1655_v12 }
 0x12d   : > { %v760_v28 = vmul.f32 %v1622_v58, %v759_v18  ;;  %v774_v8 = vsub.f32 1.0, %v773_v13  ;;  %v424_v52 = vand.u32 2147483648, %v1655_v12  ;;  %vm418_vm8 = vweird.f32 %v1655_v12 }
 0x12e   : > { %v745_v41 = vmul.f32 %v1634_v63, %v744_v22  ;;  %v1776_v53 = vstv %s942_s30  ;;  %v1785_v4 = vsel %vm1682_vm12, %v1632_v62, %v406_v29  ;;  %vm792_vm10 = vweird.f32 %v1652_v11  ;;  %vm1809_vm12 = vmor %vm747_vm15, %vm748_vm0 }
 0x12f   : > { %v761_v49 = vadd.f32 %v1622_v58, %v760_v28  ;;  %v775_v55 = vmul.f32 %v1648_v6, %v774_v8  ;;  %vm1798_vm14 = vcmp.eq.f32.partialorder %v422_v33, 8.507059e+37  ;;  %v425_v62 = vor.u32 1.1754944e-38, %v424_v52  ;;  %vm1856_vm0 = vmor %vm777_vm5, %vm778_vm3 }
 0x130   : > { %v1703_v32 = vpop.eup %1228  ;;  %v746_v59 = vadd.f32 %v1634_v63, %v745_v41  ;;  %v796_v17 = vand.u32 2147483647, %v1652_v11  ;;  %v555_v13 = vadd.s32 8, %v1661_v19  ;;  %v1827_v24 = vadd.s32 %v1776_v53, %v1661_v19 }
 0x131   : > { %v1717_v37 = vpop.eup %1230  ;;  %v1719_v40 = vpop.xlane.xlu0 %275  ;;  %v803_v50 = vmul.f32 %v1703_v32, %v1638_v1  ;;  %v765_v20 = vsel %vm1793_vm11, %v1622_v58, %v761_v49  ;;  %v776_v21 = vadd.f32 %v1648_v6, %v775_v55  ;;  %v556_v43 = vadd.s32 16, %v1661_v19 }
 0x132   : > { %v1736_v44 = vpop.eup %1232  ;;  %v788_v45 = vmul.f32 %v1717_v37, %v1652_v11  ;;  %v1740_v46 = vpop.xlane.xlu1 %273  ;;  %1234 = vrcp.f32 %v1719_v40  ;;  %v750_v38 = vsel %vm1809_vm12, %v1634_v63, %v746_v59  ;;  %vm793_vm15 = vweird.f32 %v1717_v37 }
 0x133   : > { %v1743_v47 = vpop.xlane.xlu2 %664  ;;  %v414_v48 = vmul.f32 %v1736_v44, %v1655_v12  ;;  %1236 = vrcp.f32 %v1740_v46  ;;  %v804_v0 = vsub.f32 1.0, %v803_v50  ;;  %vm419_vm13 = vweird.f32 %v1736_v44  ;;  %vm1892_vm2 = vmor %vm792_vm10, %vm793_vm15 }
 0x134   : > { %v789_v54 = vsub.f32 1.0, %v788_v45  ;;  %1238 = vrcp.f32 %v1743_v47  ;;  %v798_v63 = vand.u32 2147483648, %v1652_v11  ;;  %v780_v9 = vsel %vm1856_vm0, %v1648_v6, %v776_v21  ;;  %vm1869_vm1 = vmor %vm418_vm8, %vm419_vm13 }
 0x135   : > { %v415_v56 = vsub.f32 1.0, %v414_v48  ;;  %v805_v39 = vmul.f32 %v1703_v32, %v804_v0  ;;  %v755_v29 = vsel %vm1760_vm6, %v1686_v25, %v750_v38  ;;  %v1878_v33 = vadd.s32 %v1669_v14, %v555_v13 }
 0x136   : > { %v790_v5 = vmul.f32 %v1717_v37, %v789_v54  ;;  %v1883_v6 = vsel %vm1764_vm7, %v1707_v35, %v765_v20  ;;  %v1897_v49 = vadd.s32 %v1776_v53, %v555_v13  ;;  %vm797_vm3 = vcmp.eq.f32.partialorder %v796_v17, 8.507059e+37 }
 0x137   : > { %v416_v7 = vmul.f32 %v1736_v44, %v415_v56  ;;  %v785_v11 = vsel %vm1778_vm9, %v1723_v42, %v780_v9  ;;  %v799_v54 = vor.u32 1.1754944e-38, %v798_v63  ;;  %v1910_v16 = vadd.s32 %v1776_v53, %v556_v43 }
 0x138   : > { %v1803_v18 = vpop.eup %1234  ;;  %v791_v30 = vadd.f32 %v1717_v37, %v790_v5  ;;  %vm808_vm4 = vweird.f32 %v1703_v32  ;;  %vm807_vm5 = vweird.f32 %v1638_v1  ;;  %v811_v42 = vand.u32 2147483647, %v1638_v1 }
 0x139   : > { %v1818_v22 = vpop.eup %1236  ;;  %v1820_v23 = vpop.xlane.xlu0 %668  ;;  %v417_v3 = vadd.f32 %v1736_v44, %v416_v7  ;;  %v1847_v8 = vmul.f32 %v1803_v18, %v1719_v40  ;;  %v813_v2 = vand.u32 2147483648, %v1638_v1  ;;  %vm822_vm6 = vweird.f32 %v1743_v47  ;;  %vm1937_vm7 = vmor %vm807_vm5, %vm808_vm4 }
 0x13a   : > { %v1831_v10 = vpop.eup %1238  ;;  %v1833_v58 = vpop.xlane.xlu1 %666  ;;  %1240 = vrcp.f32 %v1820_v23  ;;  %v1843_v31 = vmul.f32 %v1818_v22, %v1740_v46  ;;  %v795_v35 = vsel %vm1892_vm2, %v1717_v37, %v791_v30  ;;  %v806_v37 = vadd.f32 %v1703_v32, %v805_v39 }
 0x13b   : > { %v1836_v28 = vpop.xlane.xlu2 %277  ;;  %v818_v36 = vmul.f32 %v1831_v10, %v1743_v47  ;;  %1242 = vrcp.f32 %v1833_v58  ;;  %v421_v12 = vsel %vm1869_vm1, %v1736_v44, %v417_v3  ;;  %v1920_v59 = vsel %vm797_vm3, %v799_v54, %v795_v35 }
 0x13c   : > { %1244 = vrcp.f32 %v1836_v28  ;;  %v430_v52 = vsub.f32 1.0, %v1843_v31  ;;  %v1914_v51 = vsel %vm1798_vm14, %v425_v62, %v421_v12  ;;  %v1928_v62 = vadd.s32 %v1669_v14, %v556_v43 }
 0x13d   : > { %v819_v25 = vsub.f32 1.0, %v818_v36  ;;  %v557_v13 = vadd.s32 24, %v1661_v19  ;;  %vm823_vm8 = vweird.f32 %v1831_v10  ;;  %vm812_vm9 = vcmp.eq.f32.partialorder %v811_v42, 8.507059e+37 }
 0x13e   : > { %v558_v36 = vadd.s32 32, %v1661_v19  ;;  %v814_v41 = vor.u32 1.1754944e-38, %v813_v2  ;;  %vm1977_vm10 = vmor %vm822_vm6, %vm823_vm8  ;;  %vm572_vm11 = vcmp.lt.s32.totalorder %v1697_v27, 300  ;;  %vm952_vm14 = vcmp.lt.s32.totalorder %v1827_v24, 300 }
 0x13f   : > { %v820_v17 = vmul.f32 %v1831_v10, %v819_v25  ;;  %v1962_v39 = vadd.s32 %v1669_v14, %v557_v13  ;;  %v1971_v42 = vadd.s32 %v1776_v53, %v557_v13  ;;  %vm953_vm13 = vcmp.lt.s32.totalorder %v1897_v49, 300 }
 0x140   : > { %v1907_v50 = vpop.eup %1240  ;;  %vm976_vm15 = vcmask 7168   ;;  %vm573_vm0 = vcmp.lt.s32.totalorder %v1878_v33, 300  ;;  %vm954_vm1 = vcmp.lt.s32.totalorder %v1910_v16, 300  ;;  %vm433_vm2 = vweird.f32 %v1740_v46 }
 0x141   : > { %v1918_v55 = vpop.eup %1242  ;;  %v1948_v21 = vmul.f32 %v1907_v50, %v1820_v23  ;;  %v1959_v43 = vadd.f32 %v1831_v10, %v820_v17  ;;  %vm574_vm3 = vcmp.lt.s32.totalorder %v1928_v62, 300  ;;  %vm434_vm4 = vweird.f32 %v1818_v22 }
 0x142   : > { %v727_v56 = vpop.xlane.xlu0 %726  ;;  %v1925_v5 = vpop.eup %1244  ;;  %v1944_v20 = vmul.f32 %v1918_v55, %v1833_v58  ;;  %vm575_vm5 = vcmp.lt.s32.totalorder %v1962_v39, 300  ;;  %vm2024_vm6 = vmor %vm433_vm2, %vm434_vm4  ;;  %vm837_vm2 = vweird.f32 %v1833_v58 }
 0x143   : > { %v338_v57 = vpop.xlane.xlu1 %337  ;;  %v756_v7 = vmul.f32 %v755_v29, %v727_v56  ;;  %v340_v61 = vpop.xlane.xlu2 %339  ;;  %v1955_v38 = vmul.f32 %v1925_v5, %v1836_v28 }
 0x144   : > { %v367_v0 = vmul.f32 %v1678_v15, %v338_v57  ;;  %v382_v34 = vmul.f32 %v1690_v26, %v340_v61  ;;  %v810_v26 = vsel %vm1937_vm7, %v1703_v32, %v806_v37  ;;  %v826_v32 = vand.u32 2147483647, %v1743_v47 }
 0x145   : > { %v862_v15 = vmax.f32 %v756_v7, 1e-07  ;;  %v1967_v25 = vsel %vm812_vm9, %v814_v41, %v810_v26  ;;  %v828_v26 = vand.u32 2147483648, %v1743_v47  ;;  %v431_v47 = vmul.f32 %v1818_v22, %v430_v52 }
 0x146   : > { %v473_v3 = vmax.f32 %v367_v0, 1e-07  ;;  %v474_v30 = vmax.f32 %v382_v34, 1e-07  ;;  %v1982_v0 = vadd.s32 %v1669_v14, %v558_v36  ;;  %v825_v34 = vsel %vm1977_vm10, %v1831_v10, %v1959_v43 }
 0x147   : > { %v870_v63 = vmin.f32 %v862_v15, 0.9999999  ;;  %vm827_vm12 = vcmp.eq.f32.partialorder %v826_v32, 8.507059e+37  ;;  %vm955_vm7 = vcmp.lt.s32.totalorder %v1971_v42, 300  ;;  %vm448_vm9 = vweird.f32 %v1719_v40 }
 0x148   : > { %v481_v9 = vmin.f32 %v473_v3, 0.9999999  ;;  %v482_v45 = vmin.f32 %v474_v30, 0.9999999  ;;  %vm449_vm10 = vweird.f32 %v1803_v18  ;;  %v467_v42 = vand.u32 2147483647, %v1836_v28 }
 0x149   : > { %v878_v48 = vsub.f32 1.0, %v870_v63  ;;  %vm576_vm4 = vcmp.lt.s32.totalorder %v1982_v0, 300 }
 0x14a   : > { %v489_v54 = vsub.f32 1.0, %v481_v9  ;;  %v490_v37 = vsub.f32 1.0, %v482_v45  ;;  %v731_v56 = vpop.xlane.xlu0 %730 }
 0x14b   : > { %v894_v57 = vmul.f32 %v878_v48, %v878_v48  ;;  %v729_v7 = vpop.xlane.xlu1 %728  ;;  %v786_v61 = vmul.f32 %v785_v11, %v731_v56  ;;  %v342_v17 = vpop.xlane.xlu2 %341 }
 0x14c   : > { %v505_v13 = vmul.f32 %v489_v54, %v489_v54  ;;  %v506_v1 = vmul.f32 %v490_v37, %v490_v37  ;;  %v771_v15 = vmul.f32 %v1883_v6, %v729_v7  ;;  %v397_v63 = vmul.f32 %v1773_v60, %v342_v17 }
 0x14d   : > { %v902_v11 = vmul.f32 0.5, %v894_v57  ;;  %v918_v3 = vmul.f32 %v894_v57, %v878_v48  ;;  %v864_v30 = vmax.f32 %v786_v61, 1e-07 }
 0x14e   : > { %v513_v41 = vmul.f32 0.5, %v505_v13  ;;  %v529_v9 = vmul.f32 %v505_v13, %v489_v54  ;;  %v514_v45 = vmul.f32 0.5, %v506_v1  ;;  %v530_v56 = vmul.f32 %v506_v1, %v490_v37 }
 0x14f   : > { %v910_v10 = vadd.f32 %v902_v11, %v878_v48  ;;  %v926_v43 = vmul.f32 0.33333334, %v918_v3  ;;  %v863_v2 = vmax.f32 %v771_v15, 1e-07  ;;  %v872_v12 = vmin.f32 %v864_v30, 0.9999999 }
 0x150   : > { %v521_v29 = vadd.f32 %v513_v41, %v489_v54  ;;  %v537_v35 = vmul.f32 0.33333334, %v529_v9  ;;  %v538_v44 = vmul.f32 0.33333334, %v530_v56  ;;  %v522_v6 = vadd.f32 %v514_v45, %v490_v37 }
 0x151   : > { %v871_v57 = vmin.f32 %v863_v2, 0.9999999  ;;  %v880_v7 = vsub.f32 1.0, %v872_v12  ;;  %v475_v61 = vmax.f32 %v397_v63, 1e-07  ;;  %v934_v60 = vadd.f32 %v926_v43, %v910_v10 }
 0x152   : > { %v346_v17 = vpop.xlane.xlu0 %345  ;;  %v1997_v13 = vadd.s32 %v1776_v53, %v558_v36  ;;  %v829_v48 = vor.u32 1.1754944e-38, %v828_v26  ;;  %v545_v1 = vadd.f32 %v537_v35, %v521_v29  ;;  %v2003_v30 = vadd.f32 %v1818_v22, %v431_v47 }
 0x153   : > { %v879_v54 = vsub.f32 1.0, %v871_v57  ;;  %v896_v15 = vmul.f32 %v880_v7, %v880_v7  ;;  %v483_v11 = vmin.f32 %v475_v61, 0.9999999  ;;  %v344_v31 = vpop.xlane.xlu1 %343  ;;  %v733_v3 = vpop.xlane.xlu2 %732  ;;  %v427_v12 = vmul.f32 %v1914_v51, %v346_v17 }
 0x154   : > { %v412_v52 = vmul.f32 %v1785_v4, %v344_v31  ;;  %v830_v37 = vsel %vm827_vm12, %v829_v48, %v825_v34  ;;  %v546_v36 = vadd.f32 %v538_v44, %v522_v6  ;;  %v801_v4 = vmul.f32 %v1920_v59, %v733_v3 }
 0x155   : > { %v895_v32 = vmul.f32 %v879_v54, %v879_v54  ;;  %v904_v29 = vmul.f32 0.5, %v896_v15  ;;  %v920_v35 = vmul.f32 %v896_v15, %v880_v7  ;;  %v491_v26 = vsub.f32 1.0, %v483_v11 }
 0x156   : > { %v476_v63 = vmax.f32 %v412_v52, 1e-07  ;;  %v477_v41 = vmax.f32 %v427_v12, 1e-07  ;;  %v580_v51 = vsel %vm572_vm11, %v545_v1, 0.0  ;;  %v960_v34 = vsel %vm952_vm14, %v934_v60, 0.0  ;;  %vm2058_vm11 = vmor %vm448_vm9, %vm449_vm10 }
 0x157   : > { %v903_v9 = vmul.f32 0.5, %v895_v32  ;;  %v919_v44 = vmul.f32 %v895_v32, %v879_v54  ;;  %v912_v45 = vadd.f32 %v904_v29, %v880_v7  ;;  %v507_v56 = vmul.f32 %v491_v26, %v491_v26 }
 0x158   : > { %v484_v10 = vmin.f32 %v476_v63, 0.9999999  ;;  %v485_v43 = vmin.f32 %v477_v41, 0.9999999  ;;  %v928_v6 = vmul.f32 0.33333334, %v920_v35  ;;  %v968_v15 = vadd.f32 %v960_v34, %v580_v51 }
 0x159   : > { %v911_v2 = vadd.f32 %v903_v9, %v879_v54  ;;  %v927_v47 = vmul.f32 0.33333334, %v919_v44  ;;  %v865_v59 = vmax.f32 %v801_v4, 1e-07  ;;  %v515_v57 = vmul.f32 0.5, %v507_v56 }
 0x15a   : > { %v531_v61 = vmul.f32 %v507_v56, %v491_v26  ;;  %v492_v17 = vsub.f32 1.0, %v484_v10  ;;  %v493_v24 = vsub.f32 1.0, %v485_v43  ;;  %v737_v1 = vpop.xlane.xlu0 %736  ;;  %v437_v7 = vand.u32 2147483647, %v1740_v46 }
 0x15b   : > { %v935_v27 = vadd.f32 %v927_v47, %v911_v2  ;;  %v873_v60 = vmin.f32 %v865_v59, 0.9999999  ;;  %v735_v48 = vpop.xlane.xlu1 %734  ;;  %v523_v11 = vadd.f32 %v515_v57, %v491_v26  ;;  %v936_v54 = vadd.f32 %v928_v6, %v912_v45 }
 0x15c   : > { %v539_v31 = vmul.f32 0.33333334, %v531_v61  ;;  %v508_v3 = vmul.f32 %v492_v17, %v492_v17  ;;  %v509_v52 = vmul.f32 %v493_v24, %v493_v24  ;;  %v816_v32 = vmul.f32 %v1967_v25, %v735_v48 }
 0x15d   : > { %v881_v12 = vsub.f32 1.0, %v873_v60  ;;  %v961_v29 = vsel %vm953_vm13, %v935_v27, 0.0  ;;  %v831_v41 = vmul.f32 %v830_v37, %v737_v1  ;;  %v2029_v49 = vsel %vm976_vm15, %v968_v15, 0.0 }
 0x15e   : > { %v516_v35 = vmul.f32 0.5, %v508_v3  ;;  %v532_v63 = vmul.f32 %v508_v3, %v492_v17  ;;  %v547_v4 = vadd.f32 %v539_v31, %v523_v11  ;;  %v533_v9 = vmul.f32 %v509_v52, %v493_v24  ;;  %v348_v31 = vpop.xlane.xlu2 %347 }
 0x15f   : > { %v897_v44 = vmul.f32 %v881_v12, %v881_v12  ;;  %v866_v51 = vmax.f32 %v816_v32, 1e-07  ;;  %v581_v25 = vsel %vm573_vm0, %v546_v36, 0.0  ;;  %v517_v37 = vmul.f32 0.5, %v509_v52 }
 0x160   : > { %v436_v34 = vsel %vm2024_vm6, %v1818_v22, %v2003_v30  ;;  %v962_v45 = vsel %vm954_vm1, %v936_v54, 0.0  ;;  %v524_v56 = vadd.f32 %v516_v35, %v492_v17  ;;  %v540_v10 = vmul.f32 0.33333334, %v532_v63 }
 0x161   : > { %v905_v43 = vmul.f32 0.5, %v897_v44  ;;  %v969_v2 = vadd.f32 %v961_v29, %v581_v25  ;;  %v921_v47 = vmul.f32 %v897_v44, %v881_v12  ;;  %v874_v6 = vmin.f32 %v866_v51, 0.9999999 }
 0x162   : > { %v867_v59 = vmax.f32 %v831_v41, 1e-07  ;;  %v582_v33 = vsel %vm574_vm3, %v547_v4, 0.0  ;;  %v541_v36 = vmul.f32 0.33333334, %v533_v9  ;;  %v439_v61 = vand.u32 2147483648, %v1740_v46 }
 0x163   : > { %v913_v57 = vadd.f32 %v905_v43, %v881_v12  ;;  %v525_v27 = vadd.f32 %v517_v37, %v493_v24  ;;  %v929_v60 = vmul.f32 0.33333334, %v921_v47  ;;  %v882_v22 = vsub.f32 1.0, %v874_v6  ;;  %v350_v26 = vpop.xlane.xlu1 %349 }
 0x164   : > { %v875_v30 = vmin.f32 %v867_v59, 0.9999999  ;;  %v548_v16 = vadd.f32 %v540_v10, %v524_v56  ;;  %vm438_vm8 = vcmp.eq.f32.partialorder %v437_v7, 8.507059e+37  ;;  %v440_v17 = vor.u32 1.1754944e-38, %v439_v61 }
 0x165   : > { %v2226_v48 = vsub.f32 1.0, %v1847_v8  ;;  %v898_v15 = vmul.f32 %v882_v22, %v882_v22  ;;  %v937_v62 = vadd.f32 %v929_v60, %v913_v57  ;;  %v454_v3 = vand.u32 2147483648, %v1719_v40 }
 0x166   : > { %v883_v11 = vsub.f32 1.0, %v875_v30  ;;  %v441_v46 = vsel %vm438_vm8, %v440_v17, %v436_v34  ;;  %v452_v8 = vand.u32 2147483647, %v1719_v40  ;;  %v2052_v12 = vsel %vm976_vm15, %v969_v2, 0.0 }
 0x167   : > { %v446_v1 = vmul.f32 %v1803_v18, %v2226_v48  ;;  %v906_v54 = vmul.f32 0.5, %v898_v15  ;;  %v922_v7 = vmul.f32 %v898_v15, %v882_v22  ;;  %v2054_v32 = vadd.f32 %v962_v45, %v582_v33 }
 0x168   : > { %v899_v52 = vmul.f32 %v883_v11, %v883_v11  ;;  %v2056_v29 = vadd.f32 %v541_v36, %v525_v27  ;;  %v442_v35 = vmul.f32 %v441_v46, %v348_v31  ;;  %v2064_v41 = vsel %vm575_vm5, %v548_v16, 0.0  ;;  %v352_v27 = vpop.xlane.xlu0 %351 }
 0x169   : > { %v447_v24 = vadd.f32 %v1803_v18, %v446_v1  ;;  %v914_v4 = vadd.f32 %v906_v54, %v882_v22  ;;  %v930_v9 = vmul.f32 0.33333334, %v922_v7  ;;  %v2071_v44 = vsel %vm955_vm7, %v937_v62, 0.0 }
 0x16a   : > { %v478_v51 = vmax.f32 %v442_v35, 1e-07  ;;  %v455_v25 = vor.u32 1.1754944e-38, %v454_v3  ;;  %v2229_v37 = vsub.f32 1.0, %v1955_v38  ;;  %v907_v39 = vmul.f32 0.5, %v899_v52 }
 0x16b   : > { %v451_v40 = vsel %vm2058_vm11, %v1803_v18, %v447_v24  ;;  %vm453_vm14 = vcmp.eq.f32.partialorder %v452_v8, 8.507059e+37  ;;  %vm463_vm12 = vweird.f32 %v1836_v28  ;;  %vm464_vm13 = vweird.f32 %v1925_v5  ;;  %v739_v24 = vpop.xlane.xlu2 %738 }
 0x16c   : > { %v461_v34 = vmul.f32 %v1925_v5, %v2229_v37  ;;  %v486_v45 = vmin.f32 %v478_v51, 0.9999999  ;;  %v456_v56 = vsel %vm453_vm14, %v455_v25, %v451_v40  ;;  %v2080_v10 = vadd.f32 %v930_v9, %v914_v4  ;;  %vm2082_vm0 = vmor %vm463_vm12, %vm464_vm13  ;;  %v741_v25 = vpop.xlane.xlu1 %740 }
 0x16d   : > { %v923_v43 = vmul.f32 %v899_v52, %v883_v11  ;;  %v457_v2 = vmul.f32 %v456_v56, %v350_v26  ;;  %v469_v47 = vand.u32 2147483648, %v1836_v28  ;;  %vm468_vm1 = vcmp.eq.f32.partialorder %v467_v42, 8.507059e+37 }
 0x16e   : > { %v462_v18 = vadd.f32 %v1925_v5, %v461_v34  ;;  %v494_v6 = vsub.f32 1.0, %v486_v45  ;;  %v2232_v33 = vsub.f32 1.0, %v1944_v20  ;;  %vm838_vm3 = vweird.f32 %v1918_v55 }
 0x16f   : > { %v479_v57 = vmax.f32 %v457_v2, 1e-07  ;;  %v470_v61 = vor.u32 1.1754944e-38, %v469_v47  ;;  %v841_v22 = vand.u32 2147483647, %v1833_v58  ;;  %v915_v30 = vadd.f32 %v907_v39, %v883_v11  ;;  %vm2099_vm5 = vmor %vm837_vm2, %vm838_vm3 }
 0x170   : > { %v466_v59 = vsel %vm2082_vm0, %v1925_v5, %v462_v18  ;;  %v835_v36 = vmul.f32 %v1918_v55, %v2232_v33  ;;  %v510_v28 = vmul.f32 %v494_v6, %v494_v6  ;;  %v843_v5 = vand.u32 2147483648, %v1833_v58 }
 0x171   : > { %v487_v20 = vmin.f32 %v479_v57, 0.9999999  ;;  %v471_v16 = vsel %vm468_vm1, %v470_v61, %v466_v59  ;;  %v2235_v48 = vsub.f32 1.0, %v1948_v21  ;;  %vm956_vm6 = vcmp.lt.s32.totalorder %v1997_v13, 300 }
 0x172   : > { %v836_v60 = vadd.f32 %v1918_v55, %v835_v36  ;;  %v518_v15 = vmul.f32 0.5, %v510_v28  ;;  %v534_v31 = vmul.f32 %v510_v28, %v494_v6  ;;  %v472_v62 = vmul.f32 %v471_v16, %v352_v27 }
 0x173   : > { %v850_v1 = vmul.f32 %v1907_v50, %v2235_v48  ;;  %v495_v58 = vsub.f32 1.0, %v487_v20  ;;  %v844_v11 = vor.u32 1.1754944e-38, %v843_v5  ;;  %vm852_vm7 = vweird.f32 %v1820_v23 }
 0x174   : > { %v840_v46 = vsel %vm2099_vm5, %v1918_v55, %v836_v60  ;;  %v526_v54 = vadd.f32 %v518_v15, %v494_v6  ;;  %v480_v21 = vmax.f32 %v472_v62, 1e-07  ;;  %vm842_vm8 = vcmp.eq.f32.partialorder %v841_v22, 8.507059e+37 }
 0x175   : > { %v851_v3 = vadd.f32 %v1907_v50, %v850_v1  ;;  %vm853_vm9 = vweird.f32 %v1907_v50  ;;  %v511_v7 = vmul.f32 %v495_v58, %v495_v58  ;;  %v845_v52 = vsel %vm842_vm8, %v844_v11, %v840_v46 }
 0x176   : > { %vm2113_vm10 = vmor %vm852_vm7, %vm853_vm9  ;;  %v856_v55 = vand.u32 2147483647, %v1820_v23  ;;  %v858_v35 = vand.u32 2147483648, %v1820_v23  ;;  %v542_v63 = vmul.f32 0.33333334, %v534_v31  ;;  %v846_v9 = vmul.f32 %v845_v52, %v739_v24 }
 0x177   : > { %v488_v4 = vmin.f32 %v480_v21, 0.9999999  ;;  %v855_v40 = vsel %vm2113_vm10, %v1907_v50, %v851_v3  ;;  %v519_v51 = vmul.f32 0.5, %v511_v7  ;;  %v535_v26 = vmul.f32 %v511_v7, %v495_v58 }
 0x178   : > { %vm857_vm11 = vcmp.eq.f32.partialorder %v856_v55, 8.507059e+37  ;;  %v859_v37 = vor.u32 1.1754944e-38, %v858_v35  ;;  %v868_v39 = vmax.f32 %v846_v9, 1e-07  ;;  %v559_v45 = vadd.s32 40, %v1661_v19 }
 0x179   : > { %v496_v34 = vsub.f32 1.0, %v488_v4  ;;  %v560_v56 = vadd.s32 48, %v1661_v19  ;;  %v931_v18 = vmul.f32 0.33333334, %v923_v43  ;;  %v527_v23 = vadd.f32 %v519_v51, %v495_v58 }
 0x17a   : > { %v543_v42 = vmul.f32 0.33333334, %v535_v26  ;;  %v860_v2 = vsel %vm857_vm11, %v859_v37, %v855_v40  ;;  %v876_v47 = vmin.f32 %v868_v39, 0.9999999  ;;  %v569_v50 = vadd.s32 %v1669_v14, %v559_v45 }
 0x17b   : > { %v512_v38 = vmul.f32 %v496_v34, %v496_v34  ;;  %v861_v6 = vmul.f32 %v860_v2, %v741_v25  ;;  %v584_v59 = vsel %vm576_vm4, %v2056_v29, 0.0  ;;  %v561_v33 = vadd.s32 56, %v1661_v19 }
 0x17c   : > { %v570_v36 = vadd.s32 %v1669_v14, %v560_v56  ;;  %v949_v57 = vadd.s32 %v1776_v53, %v559_v45  ;;  %v971_v43 = vadd.f32 %v2071_v44, %v2064_v41  ;;  %v550_v61 = vadd.f32 %v542_v63, %v526_v54 }
 0x17d   : > { %v884_v27 = vsub.f32 1.0, %v876_v47  ;;  %v869_v28 = vmax.f32 %v861_v6, 1e-07  ;;  %v939_v60 = vadd.f32 %v931_v18, %v915_v30  ;;  %v520_v22 = vmul.f32 0.5, %v512_v38 }
 0x17e   : > { %v536_v5 = vmul.f32 %v512_v38, %v496_v34  ;;  %vm577_vm14 = vcmp.lt.s32.totalorder %v569_v50, 300  ;;  %v964_v0 = vsel %vm956_vm6, %v2080_v10, 0.0  ;;  %v551_v29 = vadd.f32 %v543_v42, %v527_v23 }
 0x17f   : > { %v900_v19 = vmul.f32 %v884_v27, %v884_v27  ;;  %v877_v20 = vmin.f32 %v869_v28, 0.9999999  ;;  %v571_v16 = vadd.s32 %v1669_v14, %v561_v33  ;;  %vm578_vm12 = vcmp.lt.s32.totalorder %v570_v36, 300 }
 0x180   : > { %v950_v17 = vadd.s32 %v1776_v53, %v560_v56  ;;  %vm957_vm13 = vcmp.lt.s32.totalorder %v949_v57, 300  ;;  %v585_v30 = vsel %vm577_vm14, %v550_v61, 0.0  ;;  %v528_v1 = vadd.f32 %v520_v22, %v496_v34 }
 0x181   : > { %v908_v41 = vmul.f32 0.5, %v900_v19  ;;  %v924_v44 = vmul.f32 %v900_v19, %v884_v27  ;;  %v885_v48 = vsub.f32 1.0, %v877_v20  ;;  %v544_v15 = vmul.f32 0.33333334, %v536_v5 }
 0x182   : > { %v951_v31 = vadd.s32 %v1776_v53, %v561_v33  ;;  %v965_v62 = vsel %vm957_vm13, %v939_v60, 0.0  ;;  %v972_v58 = vadd.f32 %v964_v0, %v584_v59  ;;  %vm958_vm0 = vcmp.lt.s32.totalorder %v950_v17, 300 }
 0x183   : > { %v916_v13 = vadd.f32 %v908_v41, %v884_v27  ;;  %v932_v10 = vmul.f32 0.33333334, %v924_v44  ;;  %v901_v46 = vmul.f32 %v885_v48, %v885_v48  ;;  %v973_v11 = vadd.f32 %v965_v62, %v585_v30 }
 0x184   : > { %v979_v14 = vadd.f32 %v2052_v12, %v2029_v49  ;;  %v980_v24 = vsel %vm976_vm15, %v2054_v32, 0.0  ;;  %v982_v7 = vsel %vm976_vm15, %v971_v43, 0.0  ;;  %v552_v52 = vadd.f32 %v544_v15, %v528_v1 }
 0x185   : > { %v940_v3 = vadd.f32 %v932_v10, %v916_v13  ;;  %v909_v54 = vmul.f32 0.5, %v901_v46  ;;  %v925_v21 = vmul.f32 %v901_v46, %v885_v48  ;;  %v586_v53 = vsel %vm578_vm12, %v551_v29, 0.0 }
 0x186   : > { %v981_v8 = vadd.f32 %v980_v24, %v979_v14  ;;  %v984_v4 = vsel %vm976_vm15, %v972_v58, 0.0  ;;  %vm579_vm1 = vcmp.lt.s32.totalorder %v571_v16, 300  ;;  %vm959_vm2 = vcmp.lt.s32.totalorder %v951_v31, 300 }
 0x187   : > { %v917_v55 = vadd.f32 %v909_v54, %v885_v48  ;;  %v933_v35 = vmul.f32 0.33333334, %v925_v21  ;;  %v966_v63 = vsel %vm958_vm0, %v940_v3, 0.0  ;;  %v986_v32 = vsel %vm976_vm15, %v973_v11, 0.0 }
 0x188   : > { %v974_v49 = vadd.f32 %v966_v63, %v586_v53  ;;  %v983_v12 = vadd.f32 %v982_v7, %v981_v8  ;;  %v587_v51 = vsel %vm579_vm1, %v552_v52, 0.0 }
 0x189   : > { %v941_v9 = vadd.f32 %v933_v35, %v917_v55 }
 0x18a   : > { %v985_v40 = vadd.f32 %v984_v4, %v983_v12  ;;  %v988_v25 = vsel %vm976_vm15, %v974_v49, 0.0 }
 0x18b   : > { %v967_v26 = vsel %vm959_vm2, %v941_v9, 0.0 }
 0x18c   : > { %v975_v37 = vadd.f32 %v967_v26, %v587_v51  ;;  %v987_v34 = vadd.f32 %v986_v32, %v985_v40 }
 0x18e   : > { %v989_v39 = vadd.f32 %v988_v25, %v987_v34  ;;  %v990_v45 = vsel %vm976_vm15, %v975_v37, 0.0 }
 0x190   : > { %v991_v56 = vadd.f32 %v990_v45, %v989_v39 }
 0x192   : > { %992 = vadd.xlane.f32.xlu2 %v991_v56 }
 0x205   : > { %v993_v18 = vpop.xlane.xlu2 %992 }
 0x206   : > { %v994_v23 = vrot.slane %v993_v18, 4 }
 0x208   : > { %v995_v42 = vadd.f32 %v994_v23, %v993_v18 }
 0x20a   : > { %v996_v2 = vrot.slane %v995_v42, 2 }
 0x20c   : > { %v997_v38 = vadd.f32 %v996_v2, %v995_v42 }
 0x20e   : > { %v998_v47 = vrot.slane %v997_v38, 1 }
 0x210   : > { %v999_v6 = vadd.f32 %v998_v47, %v997_v38 }
 0x212   : > { %1136 = vpush %v999_v6 }
 0x243   : > { %s1137_s21 = spop %1136 }
 0x244   : > { %v1001_v50 = vstv %s1137_s21 }
 0x245   : > { %1002 = vst [vmem:[%s177_s14] sm:$0xff] %v1001_v50 }
 0x246   : > { %1273 = shalt.err (!%p1270_p3)
}
 0x247   : > { %1138 = dma.vmem_to_hbm [thread:$0]  (%p1365_p5), %s1017_s16, 128, %s1019_s17, %s1004_s22  }
 0x248 PF: > { %p1144_p4 = scmp.ge.s32.totalorder %s1308_s12, 2  ;;  %s1030_s29 = sand.u32 1, %s1296_s9  }
 0x249   : > { %s1031_s30 = scalar_lea.sflag [#allocation3], %s1030_s29 }
 0x24a   : > { %p1141_p7 = pnand %p1144_p4, %p1369_p6 }
 0x24c   : > { %p1142_p8 = pneg %p1141_p7 }
 0x24e   : > { %1291 = dma.done.wait (%p1142_p8), %s1031_s30, 128  }
 0x24f   : > { %1293 = vsyncadd (%p1142_p8), %s1031_s30, 4294967168  ;;  %p12_p9 = scmp.ge.s32.totalorder %s1352_s15, 5   ;;  %s2238_s9 = smov %s1300_s10 }
 0x250   : > { %s2239_s10 = smov %s1304_s11  ;;  %s2240_s11 = smov %s1363_s18 }
 0x251   : > { %s2241_s12 = smov %s1352_s15  ;;  %14 = sbr.rel (!%p12_p9) target bundleno = 3 (0x3), region = 68 }
 0x256   :  { %1037 = vsyncpa [#allocation3], 1 }
 0x257   :  { %1039 = vsyncpa [#allocation3 + $0x1], 1 }

</bundles_post_ra>
